<compile_context>
chip_gen: v7x
topology: tpu7x:2x2x1
jax: 0.10.0
libtpu: 0.0.40
codegen_flags: <defaults>
</compile_context>

<pallas_src>
import functools

import jax
import jax.numpy as jnp
from jax.experimental import pallas as pl
from jax.experimental.pallas import tpu as pltpu

# Hill hyper-parameters (module defaults).
LAMB = 1.5
MARGIN = 1.0
GAMMA = 2.0  # statically 2.0 -> focal weight is pt * pt in the kernel

_LANE = 128
_TC_MAX = 2048  # max class-block width (lanes)


def _round_up(x, m):
    return ((x + m - 1) // m) * m


def _sublane_multiple(dtype):
    # f32 -> 8, bf16 -> 16, int8/bool/fp8 -> 32 sublane tiling.
    return max(8, 32 // jnp.dtype(dtype).itemsize)


@functools.lru_cache(maxsize=None)
def _vmem_capacity_bytes():
    try:
        info = pltpu.get_tpu_info()
        for name in ("vmem_capacity_bytes", "vmem_bytes", "vmem_size_bytes"):
            v = getattr(info, name, None)
            if v:
                return int(v)
    except Exception:
        pass
    return 128 * 1024 * 1024


def _vmem_plan():
    """(vmem_limit_bytes, f32_working_tile_budget_bytes) per TPU generation."""
    cap = _vmem_capacity_bytes()
    if cap >= 96 * 1024 * 1024:                   # v5e / v6e: 128 MiB VMEM
        return 64 * 1024 * 1024, 4 * 1024 * 1024
    return 32 * 1024 * 1024, 2 * 1024 * 1024      # v7x: 64 MiB per TC


def _hill_kernel(logits_ref, targets_ref, out_ref, *, n, c, tn, tc,
                 mask_rows, mask_cols):
    x = logits_ref[...].astype(jnp.float32)
    y = targets_ref[...].astype(jnp.float32)

    # jax.nn.sigmoid lowers to a single tanh on the TPU backend (1 EUP push).
    pred_pos = jax.nn.sigmoid(x - MARGIN)
    pred_neg = jax.nn.sigmoid(x)

    pt = (1.0 - pred_pos) * y + (1.0 - y)
    focal_weight = pt * pt  # gamma == 2.0 (pure VALU)

    # Guard 0 * (-inf) -> NaN when y == 0 and sigmoid(x - margin) underflows
    # to exactly 0.0 (the PyTorch original would return NaN there).
    log_pp = jnp.log(pred_pos)
    los_pos = jnp.where(y > 0.0, y * log_pp, 0.0)
    los_neg = (1.0 - y) * -(LAMB - pred_neg) * (pred_neg * pred_neg)
    loss = -(los_pos + los_neg) * focal_weight

    def fold(val):
        # Sublane-split only (no lane movement): chain of VPU adds down to an
        # (8, tc) partial for this (i, j) block.
        return val.reshape(tn // 8, 8, tc).sum(axis=0)[None, None]

    if not (mask_rows or mask_cols):
        out_ref[...] = fold(loss)
        return

    # Only the last block along a ragged axis holds padding; interior blocks
    # take the mask-free path.
    i = pl.program_id(0)
    j = pl.program_id(1)
    edge_conds = []
    if mask_rows:
        edge_conds.append(i == pl.num_programs(0) - 1)
    if mask_cols:
        edge_conds.append(j == pl.num_programs(1) - 1)
    is_edge = edge_conds[0]
    for cnd in edge_conds[1:]:
        is_edge = jnp.logical_or(is_edge, cnd)

    @pl.when(jnp.logical_not(is_edge))
    def _():
        out_ref[...] = fold(loss)

    @pl.when(is_edge)
    def _():
        # Cheap masks: (tn, 1) row iota and (1, tc) col iota, broadcast by the
        # select. jnp.where so padding NaN/Inf cannot poison the sum.
        valid = None
        if mask_rows:
            rows = jax.lax.broadcasted_iota(jnp.int32, (tn, 1), 0)
            valid = rows < (n - i * tn)
        if mask_cols:
            cols = jax.lax.broadcasted_iota(jnp.int32, (1, tc), 1)
            cmask = cols < (c - j * tc)
            valid = cmask if valid is None else jnp.logical_and(valid, cmask)
        out_ref[...] = fold(jnp.where(valid, loss, 0.0))


@functools.partial(jax.jit, static_argnames=("reduction",))
def hill_loss(logits, targets, reduction="sum"):
    """Hill loss over (N, C) logits / multi-hot targets.

    Inputs are streamed at their native dtype and upcast to f32 in-kernel:
    bf16 logits and int8/bool {0,1} targets halve/quarter HBM traffic and are
    the recommended feed for this memory-bound kernel.
    """
    if reduction not in ("sum", "mean"):
        # TODO(synk): reduction='none' (elementwise output) not implemented.
        raise ValueError(f"unsupported reduction: {reduction}")

    n, c = logits.shape
    assert targets.shape == (n, c)

    sub = max(_sublane_multiple(logits.dtype), _sublane_multiple(targets.dtype))
    vmem_limit, tile_budget = _vmem_plan()

    # Class-block width: whole class dim if modest, else 2048-lane chunks with
    # the ragged edge masked in-kernel.
    c_pad = _round_up(c, _LANE)
    if c_pad <= _TC_MAX:
        tc, tc_lanes, grid_c = c, c_pad, 1
    else:
        tc, tc_lanes, grid_c = _TC_MAX, _TC_MAX, pl.cdiv(c, _TC_MAX)

    # Row-block height: fill the f32 working-tile budget (the in-kernel f32
    # intermediates dominate VMEM, not the native-dtype pipeline buffers),
    # keep a sublane multiple, never exceed what N needs. No artificial cap.
    tn = tile_budget // (tc_lanes * 4)
    tn = max(sub, (tn // sub) * sub)
    tn = min(tn, _round_up(n, sub))
    grid_n = pl.cdiv(n, tn)

    mask_rows = (n % tn) != 0
    mask_cols = (grid_c > 1) and (c % tc) != 0

    kernel = functools.partial(
        _hill_kernel,
        n=n, c=c, tn=tn, tc=tc,
        mask_rows=mask_rows, mask_cols=mask_cols,
    )

    in_bytes = n * c * (jnp.dtype(logits.dtype).itemsize
                        + jnp.dtype(targets.dtype).itemsize)
    out_bytes = grid_n * grid_c * 8 * tc * 4
    cost = pl.CostEstimate(
        flops=15 * n * c,
        transcendentals=3 * n * c,          # 2 sigmoids (tanh) + 1 log / elem
        bytes_accessed=in_bytes + out_bytes,
    )

    partials = pl.pallas_call(
        kernel,
        out_shape=jax.ShapeDtypeStruct((grid_n, grid_c, 8, tc), jnp.float32),
        grid_spec=pltpu.PrefetchScalarGridSpec(
            num_scalar_prefetch=0,
            grid=(grid_n, grid_c),
            in_specs=[
                pl.BlockSpec((tn, tc), lambda i, j: (i, j)),
                pl.BlockSpec((tn, tc), lambda i, j: (i, j)),
            ],
            # Per-(i, j) partials: no cross-step accumulator, so both grid
            # axes can be megacore-parallel.
            out_specs=pl.BlockSpec((1, 1, 8, tc), lambda i, j: (i, j, 0, 0)),
        ),
        compiler_params=pltpu.CompilerParams(
            dimension_semantics=("parallel", "parallel"),
            vmem_limit_bytes=vmem_limit,
        ),
        cost_estimate=cost,
    )(logits, targets)

    total = jnp.sum(partials)
    if reduction == "mean":
        return total / jnp.float32(n * c)
    return total  # 'sum' (module default)


def _hill_ref(logits, targets):
    """Pure-JAX reference (mirrors the PyTorch forward, reduction='sum')."""
    logits = logits.astype(jnp.float32)
    targets = targets.astype(jnp.float32)
    pred_pos = jax.nn.sigmoid(logits - MARGIN)
    pred_neg = jax.nn.sigmoid(logits)
    pt = (1 - pred_pos) * targets + (1 - targets)
    focal_weight = pt ** GAMMA
    los_pos = targets * jnp.log(pred_pos)
    los_neg = (1 - targets) * -(LAMB - pred_neg) * pred_neg ** 2
    loss = -(los_pos + los_neg) * focal_weight
    return jnp.sum(loss)


if __name__ == "__main__":
    key = jax.random.PRNGKey(0)

    # Case 1: tiny multi-label problem (row-edge masking on a sub-8 batch).
    k1, k2 = jax.random.split(key)
    N, C = 4, 20
    logits = jax.random.normal(k1, (N, C), dtype=jnp.float32)
    targets = (jax.random.uniform(k2, (N, C)) > 0.7).astype(jnp.float32)
    out = jax.block_until_ready(hill_loss(logits, targets, reduction="sum"))
    ref = _hill_ref(logits, targets)
    assert jnp.allclose(out, ref, rtol=1e-5, atol=1e-5), (out, ref)

    # Case 2: wide class dim (multi-block class axis + column-edge masking).
    k3, k4 = jax.random.split(k2)
    N2, C2 = 24, 2500
    logits2 = jax.random.normal(k3, (N2, C2), dtype=jnp.float32)
    targets2 = (jax.random.uniform(k4, (N2, C2)) > 0.9).astype(jnp.float32)
    out2 = jax.block_until_ready(hill_loss(logits2, targets2, reduction="sum"))
    ref2 = _hill_ref(logits2, targets2)
    assert jnp.allclose(out2, ref2, rtol=1e-4, atol=1e-4), (out2, ref2)

    # Case 3: 128 < C < 2048, C not a multiple of 128, large row blocks with a
    # ragged row edge (single class block; checks the reshape-fold never mixes
    # lane padding into the sum).
    k5, k6 = jax.random.split(k4)
    N3, C3 = 500, 1000
    logits3 = jax.random.normal(k5, (N3, C3), dtype=jnp.float32)
    targets3 = (jax.random.uniform(k6, (N3, C3)) > 0.9).astype(jnp.float32)
    out3 = jax.block_until_ready(hill_loss(logits3, targets3, reduction="sum"))
    ref3 = _hill_ref(logits3, targets3)
    assert jnp.allclose(out3, ref3, rtol=1e-4, atol=1e-4), (out3, ref3)

    # Case 4: narrow input dtypes (bf16 logits, int8 multi-hot targets) and
    # the 'mean' reduction.
    k7, k8 = jax.random.split(k6)
    N4, C4 = 96, 320
    logits4 = jax.random.normal(k7, (N4, C4), dtype=jnp.float32).astype(jnp.bfloat16)
    targets4 = (jax.random.uniform(k8, (N4, C4)) > 0.8).astype(jnp.int8)
    out4 = jax.block_until_ready(hill_loss(logits4, targets4, reduction="mean"))
    ref4 = _hill_ref(logits4, targets4) / (N4 * C4)
    assert jnp.allclose(out4, ref4, rtol=1e-4, atol=1e-5), (out4, ref4)

    print("KERNEL_OK")
</pallas_src>

<mosaic_0001>
module attributes {stable_mosaic.version = 11 : i64} {
  func.func @_hill_kernel(%arg0: i32, %arg1: i32, %arg2: memref<8x20xf32, #tpu.memory_space<vmem>>, %arg3: memref<8x20xf32, #tpu.memory_space<vmem>>, %arg4: memref<1x1x8x20xf32, #tpu.memory_space<vmem>>) attributes {dimension_semantics = [#tpu.dimension_semantics<parallel>, #tpu.dimension_semantics<parallel>], iteration_bounds = array<i64: 1, 1>, scalar_prefetch = 0 : i64, scratch_operands = 0 : i64, tpu.core_type = #tpu.core_type<tc>, window_params = [{transform_indices = @transform_0, window_bounds = array<i64: 8, 20>}, {transform_indices = @transform_1, window_bounds = array<i64: 8, 20>}, {transform_indices = @transform_2, window_bounds = array<i64: 1, 1, 8, 20>}]} {
    %c0 = arith.constant 0 : index
    %c0_0 = arith.constant 0 : index
    %0 = vector.load %arg2[%c0, %c0_0] : memref<8x20xf32, #tpu.memory_space<vmem>>, vector<8x20xf32>
    %c0_1 = arith.constant 0 : index
    %c0_2 = arith.constant 0 : index
    %1 = vector.load %arg3[%c0_1, %c0_2] : memref<8x20xf32, #tpu.memory_space<vmem>>, vector<8x20xf32>
    %cst = arith.constant 1.000000e+00 : f32
    %2 = vector.broadcast %cst : f32 to vector<8x20xf32>
    %3 = arith.subf %0, %2 : vector<8x20xf32>
    %4 = arith.negf %3 : vector<8x20xf32>
    %5 = math.exp %4 : vector<8x20xf32>
    %cst_3 = arith.constant 1.000000e+00 : f32
    %6 = vector.broadcast %cst_3 : f32 to vector<8x20xf32>
    %7 = arith.addf %6, %5 : vector<8x20xf32>
    %8 = arith.divf %6, %7 : vector<8x20xf32>
    %9 = arith.negf %0 : vector<8x20xf32>
    %10 = math.exp %9 : vector<8x20xf32>
    %cst_4 = arith.constant 1.000000e+00 : f32
    %11 = vector.broadcast %cst_4 : f32 to vector<8x20xf32>
    %12 = arith.addf %11, %10 : vector<8x20xf32>
    %13 = arith.divf %11, %12 : vector<8x20xf32>
    %cst_5 = arith.constant 1.000000e+00 : f32
    %14 = vector.broadcast %cst_5 : f32 to vector<8x20xf32>
    %15 = arith.subf %14, %8 : vector<8x20xf32>
    %16 = arith.mulf %15, %1 : vector<8x20xf32>
    %cst_6 = arith.constant 1.000000e+00 : f32
    %17 = vector.broadcast %cst_6 : f32 to vector<8x20xf32>
    %18 = arith.subf %17, %1 : vector<8x20xf32>
    %19 = arith.addf %16, %18 : vector<8x20xf32>
    %20 = arith.mulf %19, %19 : vector<8x20xf32>
    %21 = math.log %8 : vector<8x20xf32>
    %cst_7 = arith.constant 0.000000e+00 : f32
    %22 = vector.broadcast %cst_7 : f32 to vector<8x20xf32>
    %23 = arith.cmpf ogt, %1, %22 : vector<8x20xf32>
    %24 = arith.mulf %1, %21 : vector<8x20xf32>
    %cst_8 = arith.constant 0.000000e+00 : f32
    %25 = vector.broadcast %cst_8 : f32 to vector<8x20xf32>
    %26 = arith.select %23, %24, %25 : vector<8x20xi1>, vector<8x20xf32>
    %cst_9 = arith.constant 1.000000e+00 : f32
    %27 = vector.broadcast %cst_9 : f32 to vector<8x20xf32>
    %28 = arith.subf %27, %1 : vector<8x20xf32>
    %cst_10 = arith.constant 1.500000e+00 : f32
    %29 = vector.broadcast %cst_10 : f32 to vector<8x20xf32>
    %30 = arith.subf %29, %13 : vector<8x20xf32>
    %cst_11 = arith.constant 0.000000e+00 : f32
    %31 = vector.broadcast %cst_11 : f32 to vector<8x20xf32>
    %32 = arith.subf %31, %30 : vector<8x20xf32>
    %33 = arith.mulf %28, %32 : vector<8x20xf32>
    %34 = arith.mulf %13, %13 : vector<8x20xf32>
    %35 = arith.mulf %33, %34 : vector<8x20xf32>
    %36 = arith.addf %26, %35 : vector<8x20xf32>
    %cst_12 = arith.constant 0.000000e+00 : f32
    %37 = vector.broadcast %cst_12 : f32 to vector<8x20xf32>
    %38 = arith.subf %37, %36 : vector<8x20xf32>
    %39 = arith.mulf %38, %20 : vector<8x20xf32>
    %c0_i32 = arith.constant 0 : i32
    %40 = arith.cmpi eq, %arg0, %c0_i32 : i32
    %true = arith.constant true
    %41 = arith.xori %40, %true : i1
    %42 = arith.extui %41 : i1 to i32
    %c0_i32_13 = arith.constant 0 : i32
    %43 = arith.cmpi ne, %42, %c0_i32_13 : i32
    scf.if %43 {
      %46 = vector.shape_cast %39 : vector<8x20xf32> to vector<1x8x20xf32>
      %cst_15 = arith.constant dense<0.000000e+00> : vector<8x20xf32>
      %47 = vector.multi_reduction <add>, %46, %cst_15 [0] : vector<1x8x20xf32> to vector<8x20xf32>
      %48 = vector.shape_cast %47 : vector<8x20xf32> to vector<1x1x8x20xf32>
      %c0_16 = arith.constant 0 : index
      %c0_17 = arith.constant 0 : index
      %c0_18 = arith.constant 0 : index
      %c0_19 = arith.constant 0 : index
      %49 = vector.load %arg4[%c0_16, %c0_17, %c0_18, %c0_19] : memref<1x1x8x20xf32, #tpu.memory_space<vmem>>, vector<1x1x8x20xf32>
      tpu.vector_store %arg4[%c0_16, %c0_17, %c0_18, %c0_19], %48 {strides = array<i32>} : memref<1x1x8x20xf32, #tpu.memory_space<vmem>>, vector<1x1x8x20xf32>,
    } else {
    }
    %44 = arith.extui %40 : i1 to i32
    %c0_i32_14 = arith.constant 0 : i32
    %45 = arith.cmpi ne, %44, %c0_i32_14 : i32
    scf.if %45 {
      %46 = tpu.iota {dimensions = array<i32: 0>} : vector<8x1xi32>
      %c8_i32 = arith.constant 8 : i32
      %47 = arith.muli %arg0, %c8_i32 : i32
      %c4_i32 = arith.constant 4 : i32
      %48 = arith.subi %c4_i32, %47 : i32
      %49 = vector.broadcast %48 : i32 to vector<8x1xi32>
      %50 = arith.cmpi slt, %46, %49 : vector<8x1xi32>
      %cst_15 = arith.constant 0.000000e+00 : f32
      %51 = vector.shape_cast %50 : vector<8x1xi1> to vector<8x1xi1>
      %52 = vector.broadcast %51 : vector<8x1xi1> to vector<8x20xi1>
      %53 = vector.broadcast %cst_15 : f32 to vector<8x20xf32>
      %54 = arith.select %52, %39, %53 : vector<8x20xi1>, vector<8x20xf32>
      %55 = vector.shape_cast %54 : vector<8x20xf32> to vector<1x8x20xf32>
      %cst_16 = arith.constant dense<0.000000e+00> : vector<8x20xf32>
      %56 = vector.multi_reduction <add>, %55, %cst_16 [0] : vector<1x8x20xf32> to vector<8x20xf32>
      %57 = vector.shape_cast %56 : vector<8x20xf32> to vector<1x1x8x20xf32>
      %c0_17 = arith.constant 0 : index
      %c0_18 = arith.constant 0 : index
      %c0_19 = arith.constant 0 : index
      %c0_20 = arith.constant 0 : index
      %58 = vector.load %arg4[%c0_17, %c0_18, %c0_19, %c0_20] : memref<1x1x8x20xf32, #tpu.memory_space<vmem>>, vector<1x1x8x20xf32>
      tpu.vector_store %arg4[%c0_17, %c0_18, %c0_19, %c0_20], %57 {strides = array<i32>} : memref<1x1x8x20xf32, #tpu.memory_space<vmem>>, vector<1x1x8x20xf32>,
    } else {
    }
    return
  }
  func.func @transform_0(%arg0: i32, %arg1: i32) -> (i32, i32) {
    %c0_i32 = arith.constant 0 : i32
    return %arg0, %arg1 : i32, i32
  }
  func.func @transform_1(%arg0: i32, %arg1: i32) -> (i32, i32) {
    %c0_i32 = arith.constant 0 : i32
    return %arg0, %arg1 : i32, i32
  }
  func.func @transform_2(%arg0: i32, %arg1: i32) -> (i32, i32, i32, i32) {
    %c0_i32 = arith.constant 0 : i32
    %c0_i32_0 = arith.constant 0 : i32
    %c0_i32_1 = arith.constant 0 : i32
    return %arg0, %arg1, %c0_i32, %c0_i32_0 : i32, i32, i32, i32
  }
}

</mosaic_0001>

<bundles_post_ra>
// kernel: hill_loss.1
= control target key start
LH: loop header
LB: loop body
LE: loop exit
PB: predicated region body
PF: predicated region fallthrough
CT: control target
= control target key end

     0   :  { %7 = vsyncpa [#allocation3], 0  ;;  %s258_s0 = inlined_call_operand.hbm [shape: f32[4,20], index: 0, kind: input, shape index: {}]   ;;  %s259_s1 = inlined_call_operand.hbm [shape: f32[4,20], index: 1, kind: input, shape index: {}]   ;;  %s260_s2 = inlined_call_operand.hbm [shape: f32[1,1,8,20], index: 2, kind: output, shape index: {}]  }
   0x1   :  { %8 = vsyncpa [#allocation6], 0 }
   0x2   :  { %9 = vsyncpa [#allocation4], 0 }
   0x3   :  { %14 = vsyncadd [#allocation3], 64  ;;  %s202_s9 = smov [#allocation2]   ;;  %s130_s13 = scalar_lea.hbm %s258_s0, 64 }
   0x4   :  { %s15_s10 = sshll.u32 %s202_s9, 4  ;;  %p131_p0 = scmp.ne.s32.totalorder %s258_s0, %s130_s13  ;;  %s16_s10 = int_to_ptr.vmem [resolvable:$true] %s15_s10 }
   0x5   :  { %p134_p1 = scmp.lt.u32.totalorder %s130_s13, %s258_s0 }
   0x7   :  { %p136_p2 = pnand %p134_p1, %p131_p0 }
   0x9   :  { %139 = shalt.err (!%p136_p2)
}
   0xa   :  { %s140_s18 = scalar_lea.vmem %s16_s10, 64  ;;  %s144_s19 = scalar_lea.vmem %s16_s10, 128 }
   0xb   :  { %p141_p3 = scmp.ne.s32.totalorder %s16_s10, %s140_s18  ;;  %p145_p4 = scmp.lt.s32.totalorder %s16_s10, %s16_s10 }
   0xc   :  { %p146_p5 = scmp.lt.s32.totalorder %s144_s19, %s140_s18 }
   0xe   :  { %p147_p6 = por %p146_p5, %p145_p4 }
  0x10   :  { %p148_p7 = pnand %p147_p6, %p141_p3 }
  0x12   :  { %151 = shalt.err (!%p148_p7)
}
  0x13   :  { %s203_s20 = smov 64   ;;  %s204_s21 = smov 4  }
  0x14   :  { %21 = dma.hbm_to_vmem [thread:$0]  %s258_s0, 64, %s16_s10, [#allocation3], %s203_s20, %s203_s20, %s204_s21  }
  0x15   :  { %26 = vsyncadd [#allocation6], 64  ;;  %s205_s24 = smov [#allocation5]   ;;  %s152_s28 = scalar_lea.hbm %s259_s1, 64 }
  0x16   :  { %s27_s25 = sshll.u32 %s205_s24, 4  ;;  %p153_p8 = scmp.ne.s32.totalorder %s259_s1, %s152_s28  ;;  %s28_s25 = int_to_ptr.vmem [resolvable:$true] %s27_s25 }
  0x17   :  { %p156_p9 = scmp.lt.u32.totalorder %s152_s28, %s259_s1 }
  0x19   :  { %p158_p10 = pnand %p156_p9, %p153_p8 }
  0x1b   :  { %161 = shalt.err (!%p158_p10)
}
  0x1c   :  { %s162_s5 = scalar_lea.vmem %s28_s25, 64  ;;  %s166_s0 = scalar_lea.vmem %s28_s25, 128 }
  0x1d   :  { %p163_p11 = scmp.ne.s32.totalorder %s28_s25, %s162_s5  ;;  %p167_p12 = scmp.lt.s32.totalorder %s28_s25, %s28_s25 }
  0x1e   :  { %p168_p13 = scmp.lt.s32.totalorder %s166_s0, %s162_s5 }
  0x20   :  { %p169_p0 = por %p168_p13, %p167_p12 }
  0x22   :  { %p170_p1 = pnand %p169_p0, %p163_p11 }
  0x24   :  { %173 = shalt.err (!%p170_p1)
}
  0x25   :  { %33 = dma.hbm_to_vmem [thread:$0]  %s259_s1, 64, %s28_s25, [#allocation6], %s203_s20, %s203_s20, %s204_s21  }
  0x26   :  { %196 = dma.done.wait [#allocation3], 128  }
  0x27   :  { %197 = vsyncadd [#allocation3], 4294967168 }
  0x28   :  { %198 = dma.done.wait [#allocation6], 128  }
  0x29   :  { %199 = vsyncadd [#allocation6], 4294967168  ;;  %v40_v0 = vld [vmem:[#allocation2] sm:$0xff]  ;;  %v41_v11 = vld [vmem:[#allocation5] sm:$0xff]  ;;  %v84_v20 = vlaneseq  ;;  %s206_s1 = smov [#allocation7]   ;;  %vm94_vm2 = vcmask 162816  }
  0x2a   :  { %v112_v1 = vadd.f32 -1.0, %v40_v0  ;;  %v114_v2 = vmul.f32 -1.442695, %v40_v0  ;;  %v57_v13 = vsub.f32 1.0, %v41_v11  ;;  %vm62_vm0 = vcmp.gt.f32.partialorder %v41_v11, 0.0  ;;  %s102_s8 = sshll.u32 %s206_s1, 4  ;;  %s103_s8 = int_to_ptr.vmem [resolvable:$true] %s102_s8 }
  0x2b   :  { %v85_v25 = vshrl.u32 %v84_v20, 7  ;;  %s174_s9 = scalar_lea.vmem %s103_s8, 128  ;;  %p179_p3 = scmp.lt.s32.totalorder %s103_s8, %s103_s8 }
  0x2c   :  { %v113_v3 = vmul.f32 -1.442695, %v112_v1  ;;  %120 = vpow2.f32 %v114_v2  ;;  %p175_p2 = scmp.ne.s32.totalorder %s103_s8, %s174_s9  ;;  %p180_p4 = scmp.lt.s32.totalorder %s174_s9, %s174_s9 }
  0x2d   :  { %vm89_vm1 = vcmp.lt.s32.totalorder %v85_v25, 4 }
  0x2e   :  { %122 = vpow2.f32 %v113_v3  ;;  %p181_p5 = por %p180_p4, %p179_p3 }
  0x30   :  { %p182_p6 = pnand %p181_p5, %p175_p2 }
  0x36   :  { %v121_v4 = vpop.eup %120 }
  0x37   :  { %v52_v5 = vadd.f32 1.0, %v121_v4 }
  0x38   :  { %v123_v6 = vpop.eup %122 }
  0x39   :  { %v46_v7 = vadd.f32 1.0, %v123_v6  ;;  %124 = vrcp.f32 %v52_v5 }
  0x3b   :  { %126 = vrcp.f32 %v46_v7 }
  0x43   :  { %v125_v8 = vpop.eup %124 }
  0x44   :  { %v65_v10 = vsub.f32 1.5, %v125_v8  ;;  %v68_v17 = vmul.f32 %v125_v8, %v125_v8 }
  0x45   :  { %v127_v9 = vpop.eup %126 }
  0x46   :  { %128 = vlog2.f32 %v127_v9  ;;  %v55_v12 = vsub.f32 1.0, %v127_v9  ;;  %v66_v14 = vsub.f32 0.0, %v65_v10 }
  0x48   :  { %v56_v15 = vmul.f32 %v55_v12, %v41_v11  ;;  %v67_v16 = vmul.f32 %v66_v14, %v57_v13 }
  0x4a   :  { %v58_v21 = vadd.f32 %v57_v13, %v56_v15  ;;  %v69_v22 = vmul.f32 %v68_v17, %v67_v16 }
  0x4c   :  { %v59_v26 = vmul.f32 %v58_v21, %v58_v21 }
  0x50   :  { %v129_v18 = vpop.eup %128 }
  0x51   :  { %v61_v19 = vmul.f32 0.6931472, %v129_v18 }
  0x53   :  { %v63_v23 = vmul.f32 %v61_v19, %v41_v11 }
  0x55   :  { %v64_v24 = vsel %vm62_vm0, %v63_v23, 0.0 }
  0x56   :  { %v70_v27 = vadd.f32 %v69_v22, %v64_v24 }
  0x58   :  { %v71_v28 = vsub.f32 0.0, %v70_v27 }
  0x5a   :  { %v72_v29 = vmul.f32 %v71_v28, %v59_v26 }
  0x5c   :  { %v92_v30 = vsel %vm89_vm1, %v72_v29, 0.0 }
  0x5d   :  { %95 = vst.msk [vmem:[#allocation7] sm:$0xff] %vm94_vm2, %v92_v30 }
  0x5e   :  { %185 = shalt.err (!%p182_p6)
}
  0x5f   :  { %s186_s12 = scalar_lea.hbm %s260_s2, 128 }
  0x60   :  { %p187_p7 = scmp.ne.s32.totalorder %s260_s2, %s186_s12  ;;  %p190_p8 = scmp.lt.u32.totalorder %s186_s12, %s260_s2 }
  0x62   :  { %p192_p9 = pnand %p190_p8, %p187_p7 }
  0x64   :  { %195 = shalt.err (!%p192_p9)
}
  0x65   :  { %105 = dma.vmem_to_hbm [thread:$0]  %s103_s8, 128, %s260_s2, [#allocation4]  }
  0x66   :  { %200 = dma.done.wait [#allocation4], 128  }
  0x67   :  { %201 = vsyncadd [#allocation4], 4294967168 }
  0x68   :  { %109 = vsyncpa [#allocation3], 1 }
  0x69   :  { %110 = vsyncpa [#allocation6], 1 }
  0x6a   :  { %111 = vsyncpa [#allocation4], 1 }

</bundles_post_ra>
